<compile_context>
chip_gen: v7x
topology: tpu7x:2x2x1
jax: 0.10.0
libtpu: 0.0.40
codegen_flags: <defaults>
</compile_context>

<pallas_src>
import functools

import jax
import jax.numpy as jnp
from jax.experimental import pallas as pl
from jax.experimental.pallas import tpu as pltpu

EPS = 1e-5


# ---------------------------------------------------------------------------
# generation-aware sizing
# ---------------------------------------------------------------------------
def _vmem_limit_bytes():
    """~3/4 of physical VMEM, capped at 96 MiB (64-96 MiB on 128-MiB v5e/v6e,
    ~48 MiB on v7x's 64-MiB VMEM).  Falls back to a v7x-safe value if the
    hardware query is unavailable."""
    cap = 64 << 20
    try:
        info = pltpu.get_tpu_info()
        cap = int(getattr(info, "vmem_capacity_bytes", cap))
    except Exception:
        pass
    return max(16 << 20, min((cap * 3) // 4, 96 << 20))


def _pick_tile_n(n, l, k, c_in, c_mid, c_out, vmem_limit):
    """Largest batch tile that (a) divides N, (b) keeps the block lane width
    tile_n*L a multiple of 128 (or covers the whole batch), (c) fits ~half the
    VMEM budget (double-buffered blocks + in-kernel temporaries), and (d) leaves
    >=2 grid steps when possible so both v7x TensorCores get work."""
    c_w = max(c_in, c_mid, c_out)
    per_sample = 4 * l * (2 * (c_mid + c_w) + (k + 1) * c_w + c_out)
    cap = max(1, (vmem_limit // 2) // per_sample)
    cands = [d for d in range(1, n + 1)
             if n % d == 0 and ((d * l) % 128 == 0 or d == n)]
    fitting = [d for d in cands if d <= cap] or [min(cands)]
    multi = [d for d in fitting if d < n]
    return max(multi) if multi else max(fitting)


# ---------------------------------------------------------------------------
# in-kernel helpers (shared by the three passes)
# ---------------------------------------------------------------------------
def _conv_acc(z, w_ref, k, tb_out):
    """acc[:, b] = sum_j W_j @ z[:, b+j] for b < tb_out, as K lane-dense MXU
    matmuls accumulated in f32 (no per-sample loop, no im2col concat)."""
    c_out = w_ref.shape[1]
    acc = jnp.zeros((c_out, tb_out), jnp.float32)
    for j in range(k):                      # K=3 static taps
        acc = acc + jnp.dot(w_ref[j], z[:, j:j + tb_out],
                            preferred_element_type=jnp.float32)
    return acc


def _masked_stats(acc, mask):
    """Per-channel [sum, sum_sq] over valid lanes only (dead per-sample tail
    lanes masked out).  Returns (C, 2)."""
    am = jnp.where(mask > 0.0, acc, 0.0)
    s = jnp.sum(am, axis=1, keepdims=True)
    ss = jnp.sum(am * am, axis=1, keepdims=True)
    return jnp.concatenate([s, ss], axis=1)


def _store_padded(o_ref, y, tb, tb_out):
    o_ref[:, :tb_out] = y.astype(o_ref.dtype)
    if tb_out < tb:   # zero the (K-1)-lane dead tail so downstream reads stay finite
        o_ref[:, tb_out:] = jnp.zeros((y.shape[0], tb - tb_out), o_ref.dtype)


# ---------------------------------------------------------------------------
# kernels
# ---------------------------------------------------------------------------
def _make_conv_stats_kernel(k, tb, tb_out):
    """Pass A: conv1 on a (C_in, TB) tile -> y1 tile + per-tile BN1 partial stats."""
    def kernel(x_ref, w_ref, mask_ref, y_ref, stats_ref):
        z = x_ref[...].astype(jnp.float32)
        acc = _conv_acc(z, w_ref, k, tb_out)
        _store_padded(y_ref, acc, tb, tb_out)
        stats_ref[0] = _masked_stats(acc, mask_ref[...])
    return kernel


def _make_bnrelu_conv_stats_kernel(k, tb_out):
    """Pass B: fused BN1+ReLU -> conv2 -> per-tile BN2 partial stats ONLY
    (y2 is never written to HBM; it is recomputed in pass C)."""
    def kernel(x_ref, scale_ref, shift_ref, w_ref, mask_ref, stats_ref):
        z = jnp.maximum(x_ref[...].astype(jnp.float32) * scale_ref[...]
                        + shift_ref[...], 0.0)
        acc = _conv_acc(z, w_ref, k, tb_out)
        stats_ref[0] = _masked_stats(acc, mask_ref[...])
    return kernel


def _make_bnrelu_conv_bnrelu_kernel(k, tb, tb_out):
    """Pass C: BN1+ReLU -> conv2 (recomputed) -> BN2+ReLU -> output tile."""
    def kernel(x_ref, scale1_ref, shift1_ref, w_ref, scale2_ref, shift2_ref, o_ref):
        z = jnp.maximum(x_ref[...].astype(jnp.float32) * scale1_ref[...]
                        + shift1_ref[...], 0.0)
        acc = _conv_acc(z, w_ref, k, tb_out)
        y = jnp.maximum(acc * scale2_ref[...] + shift2_ref[...], 0.0)
        _store_padded(o_ref, y, tb, tb_out)
    return kernel


# ---------------------------------------------------------------------------
# host-side helper (tiny per-channel math between pallas_calls)
# ---------------------------------------------------------------------------
def _fold_bn(partial_stats, gamma, beta, count):
    """(num_tiles, C, 2) per-tile [sum, sum_sq] -> folded (scale, shift), (C,1).
    Single-pass var = E[y^2]-E[y]^2 (clamped); fine for roughly zero-mean convs."""
    s = jnp.sum(partial_stats[:, :, 0], axis=0)
    ss = jnp.sum(partial_stats[:, :, 1], axis=0)
    mean = s / count
    var = jnp.maximum(ss / count - mean * mean, 0.0)   # biased var (train-mode BN)
    scale = gamma * jax.lax.rsqrt(var + EPS)
    shift = beta - mean * scale
    return scale.reshape(-1, 1), shift.reshape(-1, 1)


# ---------------------------------------------------------------------------
# public wrapper
# ---------------------------------------------------------------------------
@functools.partial(jax.jit, static_argnames=("kernel_size", "tile_n"))
def double_oned_conv_bn_relu(x_ncl, params, kernel_size=3, tile_n=None):
    """x_ncl: (N, C_in, L) float32 (PyTorch NCL layout).
    Returns (N, C_out, L - 2*(kernel_size-1)), matching the PyTorch module in
    training mode (batch BN stats, biased variance, eps=1e-5, ReLU)."""
    (w1, b1, g1, be1, w2, b2, g2, be2) = params
    del b1, b2   # conv bias is exactly cancelled by train-mode BN mean subtraction
    n, c_in, l = x_ncl.shape
    k = kernel_size
    c_mid, c_out = w1.shape[0], w2.shape[0]
    l1 = l - (k - 1)
    l2 = l1 - (k - 1)
    assert l2 >= 1, "sequence too short for two valid convolutions"

    vmem_limit = _vmem_limit_bytes()
    tn = tile_n if tile_n is not None else _pick_tile_n(
        n, l, k, c_in, c_mid, c_out, vmem_limit)
    assert n % tn == 0, "tile_n must divide the batch size"
    assert (tn * l) % 128 == 0 or tn == n, (
        "tile lane width (tile_n*L) must be a multiple of 128 or cover the batch")
    nt = n // tn
    tb = tn * l            # lanes per tile
    tbo = tb - (k - 1)     # lanes actually produced by a conv over the tile

    # Lane-dense working layout: channels on sublanes, flattened N*L on lanes.
    x2d = jnp.transpose(x_ncl, (1, 0, 2)).reshape(c_in, n * l)

    # PyTorch (C_out, C_in, K) -> (K, C_out, C_in): one MXU matmul per tap.
    w1k = jnp.transpose(w1, (2, 0, 1))
    w2k = jnp.transpose(w2, (2, 0, 1))

    # Valid-lane masks for the BN statistics (identical for every tile because
    # tiles are sample-aligned).
    def lane_mask(l_valid):
        per = jnp.concatenate([jnp.ones((l_valid,), jnp.float32),
                               jnp.zeros((l - l_valid,), jnp.float32)])
        return jnp.tile(per, (tn,))[None, :tbo]
    mask1 = lane_mask(l1)
    mask2 = lane_mask(l2)

    cparams = pltpu.CompilerParams(
        dimension_semantics=("parallel",),     # batch tiles are independent
        vmem_limit_bytes=vmem_limit)

    def io_spec(c):
        return pl.BlockSpec((c, tb), lambda i: (0, i))

    def bcast_spec(shape):
        return pl.BlockSpec(shape, lambda i: tuple(0 for _ in shape))

    def stats_spec(c):
        return pl.BlockSpec((1, c, 2), lambda i: (i, 0, 0))

    # --- Pass A: conv1 -> y1 (stays in (C_mid, N*L)) + BN1 partial stats. -----
    y1, st1 = pl.pallas_call(
        _make_conv_stats_kernel(k, tb, tbo),
        grid=(nt,),
        in_specs=[io_spec(c_in), bcast_spec((k, c_mid, c_in)), bcast_spec((1, tbo))],
        out_specs=[io_spec(c_mid), stats_spec(c_mid)],
        out_shape=(jax.ShapeDtypeStruct((c_mid, n * l), jnp.float32),
                   jax.ShapeDtypeStruct((nt, c_mid, 2), jnp.float32)),
        compiler_params=cparams,
    )(x2d, w1k, mask1)
    scale1, shift1 = _fold_bn(st1, g1, be1, n * l1)

    # --- Pass B: BN1+ReLU + conv2 -> BN2 partial stats only (no y2 HBM write). -
    st2 = pl.pallas_call(
        _make_bnrelu_conv_stats_kernel(k, tbo),
        grid=(nt,),
        in_specs=[io_spec(c_mid), bcast_spec((c_mid, 1)), bcast_spec((c_mid, 1)),
                  bcast_spec((k, c_out, c_mid)), bcast_spec((1, tbo))],
        out_specs=stats_spec(c_out),
        out_shape=jax.ShapeDtypeStruct((nt, c_out, 2), jnp.float32),
        compiler_params=cparams,
    )(y1, scale1, shift1, w2k, mask2)
    scale2, shift2 = _fold_bn(st2, g2, be2, n * l2)

    # --- Pass C: recompute conv2 from y1, fused with BN1+ReLU and BN2+ReLU. ---
    out2d = pl.pallas_call(
        _make_bnrelu_conv_bnrelu_kernel(k, tb, tbo),
        grid=(nt,),
        in_specs=[io_spec(c_mid), bcast_spec((c_mid, 1)), bcast_spec((c_mid, 1)),
                  bcast_spec((k, c_out, c_mid)),
                  bcast_spec((c_out, 1)), bcast_spec((c_out, 1))],
        out_specs=io_spec(c_out),
        out_shape=jax.ShapeDtypeStruct((c_out, n * l), jnp.float32),
        compiler_params=cparams,
    )(y1, scale1, shift1, w2k, scale2, shift2)

    # Back to PyTorch (N, C_out, L_out): drop each sample's dead tail lanes and
    # transpose (boundary-tensor layout plumbing left to XLA).
    return jnp.transpose(out2d.reshape(c_out, n, l)[:, :, :l2], (1, 0, 2))


# ---------------------------------------------------------------------------
# params + pure-JAX reference (for a numerical self-check)
# ---------------------------------------------------------------------------
def init_params(key, in_ch, mid_ch, out_ch, kernel_size=3):
    """Synthetic params in PyTorch layouts: conv weight (C_out, C_in, K), bias (C),
    BN gamma/beta (C)."""
    keys = jax.random.split(key, 8)
    w1 = jax.random.normal(keys[0], (mid_ch, in_ch, kernel_size), jnp.float32) * 0.1
    b1 = jax.random.normal(keys[1], (mid_ch,), jnp.float32) * 0.1
    g1 = 1.0 + 0.1 * jax.random.normal(keys[2], (mid_ch,), jnp.float32)
    be1 = 0.1 * jax.random.normal(keys[3], (mid_ch,), jnp.float32)
    w2 = jax.random.normal(keys[4], (out_ch, mid_ch, kernel_size), jnp.float32) * 0.1
    b2 = jax.random.normal(keys[5], (out_ch,), jnp.float32) * 0.1
    g2 = 1.0 + 0.1 * jax.random.normal(keys[6], (out_ch,), jnp.float32)
    be2 = 0.1 * jax.random.normal(keys[7], (out_ch,), jnp.float32)
    return (w1, b1, g1, be1, w2, b2, g2, be2)


def reference(x, params, kernel_size=3):
    """Pure-JAX replica of the PyTorch module (training mode), incl. conv bias."""
    (w1, b1, g1, be1, w2, b2, g2, be2) = params

    def block(z, w, b, g, be):
        k = w.shape[2]
        lo = z.shape[2] - (k - 1)
        acc = jnp.zeros((z.shape[0], w.shape[0], lo), jnp.float32)
        for j in range(k):
            acc = acc + jnp.einsum('oc,ncl->nol', w[:, :, j], z[:, :, j:j + lo],
                                   precision=jax.lax.Precision.HIGHEST)
        y = acc + b[None, :, None]
        mean = jnp.mean(y, axis=(0, 2), keepdims=True)
        var = jnp.mean((y - mean) ** 2, axis=(0, 2), keepdims=True)
        yn = (y - mean) * jax.lax.rsqrt(var + EPS)
        return jnp.maximum(yn * g[None, :, None] + be[None, :, None], 0.0)

    return block(block(x, w1, b1, g1, be1), w2, b2, g2, be2)


if __name__ == "__main__":
    # Small shapes consistent with the module: Conv1d input is (N, C_in, L).
    # N=16, L=16 lets the tile heuristic pick tile_n=8 (tile lane width 128),
    # exercising a 2-step pipelined grid and the cross-tile BN stats reduction.
    N, C_IN, C_MID, C_OUT, L = 16, 4, 8, 16, 16

    key = jax.random.PRNGKey(0)
    kx, kp = jax.random.split(key)
    x = jax.random.normal(kx, (N, C_IN, L), jnp.float32)
    params = init_params(kp, C_IN, C_MID, C_OUT)

    out = double_oned_conv_bn_relu(x, params, kernel_size=3)
    out = jax.block_until_ready(out)

    assert out.shape == (N, C_OUT, L - 4), out.shape
    assert bool(jnp.all(jnp.isfinite(out)))
    assert bool(jnp.all(out >= 0.0))  # ReLU output
    ref = reference(x, params)
    max_err = float(jnp.max(jnp.abs(out - ref)))
    assert max_err < 2e-4, f"mismatch vs reference: {max_err}"
    print("KERNEL_OK")
</pallas_src>

<mosaic_0001>
module attributes {stable_mosaic.version = 11 : i64} {
  func.func @kernel(%arg0: i32, %arg1: memref<4x128xf32, #tpu.memory_space<vmem>>, %arg2: memref<3x8x4xf32, #tpu.memory_space<vmem>>, %arg3: memref<1x126xf32, #tpu.memory_space<vmem>>, %arg4: memref<8x128xf32, #tpu.memory_space<vmem>>, %arg5: memref<1x8x2xf32, #tpu.memory_space<vmem>>) attributes {dimension_semantics = [#tpu.dimension_semantics<parallel>], iteration_bounds = array<i64: 2>, scalar_prefetch = 0 : i64, scratch_operands = 0 : i64, tpu.core_type = #tpu.core_type<tc>, window_params = [{transform_indices = @transform_0, window_bounds = array<i64: 4, 128>}, {pipeline_mode = #tpu.pipeline_mode<synchronous>, transform_indices = @transform_1, window_bounds = array<i64: 3, 8, 4>}, {pipeline_mode = #tpu.pipeline_mode<synchronous>, transform_indices = @transform_2, window_bounds = array<i64: 1, 126>}, {transform_indices = @transform_3, window_bounds = array<i64: 8, 128>}, {transform_indices = @transform_4, window_bounds = array<i64: 1, 8, 2>}]} {
    %c0 = arith.constant 0 : index
    %c0_0 = arith.constant 0 : index
    %0 = vector.load %arg1[%c0, %c0_0] : memref<4x128xf32, #tpu.memory_space<vmem>>, vector<4x128xf32>
    %cst = arith.constant 0.000000e+00 : f32
    %1 = vector.broadcast %cst : f32 to vector<8x126xf32>
    %c0_1 = arith.constant 0 : index
    %c0_2 = arith.constant 0 : index
    %c0_3 = arith.constant 0 : index
    %2 = vector.load %arg2[%c0_1, %c0_2, %c0_3] : memref<3x8x4xf32, #tpu.memory_space<vmem>>, vector<1x8x4xf32>
    %3 = vector.shape_cast %2 : vector<1x8x4xf32> to vector<8x4xf32>
    %4 = vector.extract_strided_slice %0 {offsets = [0, 0], sizes = [4, 126], strides = [1, 1]} : vector<4x128xf32> to vector<4x126xf32>
    %cst_4 = arith.constant dense<0.000000e+00> : vector<8x126xf32>
    %5 = tpu.matmul %3, %4, %cst_4 {dimension_numbers = #tpu.dot_dimension_numbers<[1], [0], [0], [1], [0, 0, 1, 1], [], []>} : vector<8x4xf32>, vector<4x126xf32>, vector<8x126xf32> -> vector<8x126xf32>
    %6 = arith.addf %1, %5 : vector<8x126xf32>
    %c1 = arith.constant 1 : index
    %c0_5 = arith.constant 0 : index
    %c0_6 = arith.constant 0 : index
    %7 = vector.load %arg2[%c1, %c0_5, %c0_6] : memref<3x8x4xf32, #tpu.memory_space<vmem>>, vector<1x8x4xf32>
    %8 = vector.shape_cast %7 : vector<1x8x4xf32> to vector<8x4xf32>
    %9 = vector.extract_strided_slice %0 {offsets = [0, 1], sizes = [4, 126], strides = [1, 1]} : vector<4x128xf32> to vector<4x126xf32>
    %cst_7 = arith.constant dense<0.000000e+00> : vector<8x126xf32>
    %10 = tpu.matmul %8, %9, %cst_7 {dimension_numbers = #tpu.dot_dimension_numbers<[1], [0], [0], [1], [0, 0, 1, 1], [], []>} : vector<8x4xf32>, vector<4x126xf32>, vector<8x126xf32> -> vector<8x126xf32>
    %11 = arith.addf %6, %10 : vector<8x126xf32>
    %c2 = arith.constant 2 : index
    %c0_8 = arith.constant 0 : index
    %c0_9 = arith.constant 0 : index
    %12 = vector.load %arg2[%c2, %c0_8, %c0_9] : memref<3x8x4xf32, #tpu.memory_space<vmem>>, vector<1x8x4xf32>
    %13 = vector.shape_cast %12 : vector<1x8x4xf32> to vector<8x4xf32>
    %14 = vector.extract_strided_slice %0 {offsets = [0, 2], sizes = [4, 126], strides = [1, 1]} : vector<4x128xf32> to vector<4x126xf32>
    %cst_10 = arith.constant dense<0.000000e+00> : vector<8x126xf32>
    %15 = tpu.matmul %13, %14, %cst_10 {dimension_numbers = #tpu.dot_dimension_numbers<[1], [0], [0], [1], [0, 0, 1, 1], [], []>} : vector<8x4xf32>, vector<4x126xf32>, vector<8x126xf32> -> vector<8x126xf32>
    %16 = arith.addf %11, %15 : vector<8x126xf32>
    %c0_11 = arith.constant 0 : index
    %c0_12 = arith.constant 0 : index
    %17 = vector.load %arg4[%c0_11, %c0_12] : memref<8x128xf32, #tpu.memory_space<vmem>>, vector<8x126xf32>
    tpu.vector_store %arg4[%c0_11, %c0_12], %16 {strides = array<i32>} : memref<8x128xf32, #tpu.memory_space<vmem>>, vector<8x126xf32>,
    %cst_13 = arith.constant 0.000000e+00 : f32
    %18 = vector.broadcast %cst_13 : f32 to vector<8x2xf32>
    %c0_14 = arith.constant 0 : index
    %c126 = arith.constant 126 : index
    %19 = vector.load %arg4[%c0_14, %c126] : memref<8x128xf32, #tpu.memory_space<vmem>>, vector<8x2xf32>
    tpu.vector_store %arg4[%c0_14, %c126], %18 {strides = array<i32>} : memref<8x128xf32, #tpu.memory_space<vmem>>, vector<8x2xf32>,
    %c0_15 = arith.constant 0 : index
    %c0_16 = arith.constant 0 : index
    %20 = vector.load %arg3[%c0_15, %c0_16] : memref<1x126xf32, #tpu.memory_space<vmem>>, vector<1x126xf32>
    %cst_17 = arith.constant 0.000000e+00 : f32
    %21 = vector.broadcast %cst_17 : f32 to vector<1x126xf32>
    %22 = arith.cmpf ogt, %20, %21 : vector<1x126xf32>
    %cst_18 = arith.constant 0.000000e+00 : f32
    %23 = vector.shape_cast %22 : vector<1x126xi1> to vector<1x126xi1>
    %24 = vector.broadcast %23 : vector<1x126xi1> to vector<8x126xi1>
    %25 = vector.broadcast %cst_18 : f32 to vector<8x126xf32>
    %26 = arith.select %24, %16, %25 : vector<8x126xi1>, vector<8x126xf32>
    %cst_19 = arith.constant dense<0.000000e+00> : vector<8xf32>
    %27 = vector.multi_reduction <add>, %26, %cst_19 [1] : vector<8x126xf32> to vector<8xf32>
    %28 = vector.shape_cast %27 : vector<8xf32> to vector<8x1xf32>
    %29 = arith.mulf %26, %26 : vector<8x126xf32>
    %cst_20 = arith.constant dense<0.000000e+00> : vector<8xf32>
    %30 = vector.multi_reduction <add>, %29, %cst_20 [1] : vector<8x126xf32> to vector<8xf32>
    %31 = vector.shape_cast %30 : vector<8xf32> to vector<8x1xf32>
    %32 = tpu.concatenate %28, %31 in 1 : vector<8x1xf32>, vector<8x1xf32> -> vector<8x2xf32>
    %c0_21 = arith.constant 0 : index
    %c0_22 = arith.constant 0 : index
    %c0_23 = arith.constant 0 : index
    %33 = vector.load %arg5[%c0_21, %c0_22, %c0_23] : memref<1x8x2xf32, #tpu.memory_space<vmem>>, vector<1x8x2xf32>
    %34 = vector.shape_cast %33 : vector<1x8x2xf32> to vector<8x2xf32>
    %35 = vector.shape_cast %32 : vector<8x2xf32> to vector<1x8x2xf32>
    tpu.vector_store %arg5[%c0_21, %c0_22, %c0_23], %35 {strides = array<i32>} : memref<1x8x2xf32, #tpu.memory_space<vmem>>, vector<1x8x2xf32>,
    return
  }
  func.func @transform_0(%arg0: i32) -> (i32, i32) {
    %c0_i32 = arith.constant 0 : i32
    %c0_i32_0 = arith.constant 0 : i32
    return %c0_i32, %arg0 : i32, i32
  }
  func.func @transform_1(%arg0: i32) -> (i32, i32, i32) {
    %c0_i32 = arith.constant 0 : i32
    %c0_i32_0 = arith.constant 0 : i32
    %c0_i32_1 = arith.constant 0 : i32
    %c0_i32_2 = arith.constant 0 : i32
    return %c0_i32, %c0_i32_0, %c0_i32_1 : i32, i32, i32
  }
  func.func @transform_2(%arg0: i32) -> (i32, i32) {
    %c0_i32 = arith.constant 0 : i32
    %c0_i32_0 = arith.constant 0 : i32
    %c0_i32_1 = arith.constant 0 : i32
    return %c0_i32, %c0_i32_0 : i32, i32
  }
  func.func @transform_3(%arg0: i32) -> (i32, i32) {
    %c0_i32 = arith.constant 0 : i32
    %c0_i32_0 = arith.constant 0 : i32
    return %c0_i32, %arg0 : i32, i32
  }
  func.func @transform_4(%arg0: i32) -> (i32, i32, i32) {
    %c0_i32 = arith.constant 0 : i32
    %c0_i32_0 = arith.constant 0 : i32
    %c0_i32_1 = arith.constant 0 : i32
    return %arg0, %c0_i32, %c0_i32_0 : i32, i32, i32
  }
}

module attributes {stable_mosaic.version = 11 : i64} {
  func.func @kernel(%arg0: i32, %arg1: memref<8x128xf32, #tpu.memory_space<vmem>>, %arg2: memref<8x1xf32, #tpu.memory_space<vmem>>, %arg3: memref<8x1xf32, #tpu.memory_space<vmem>>, %arg4: memref<3x16x8xf32, #tpu.memory_space<vmem>>, %arg5: memref<1x126xf32, #tpu.memory_space<vmem>>, %arg6: memref<1x16x2xf32, #tpu.memory_space<vmem>>) attributes {dimension_semantics = [#tpu.dimension_semantics<parallel>], iteration_bounds = array<i64: 2>, scalar_prefetch = 0 : i64, scratch_operands = 0 : i64, tpu.core_type = #tpu.core_type<tc>, window_params = [{transform_indices = @transform_0, window_bounds = array<i64: 8, 128>}, {pipeline_mode = #tpu.pipeline_mode<synchronous>, transform_indices = @transform_1, window_bounds = array<i64: 8, 1>}, {pipeline_mode = #tpu.pipeline_mode<synchronous>, transform_indices = @transform_2, window_bounds = array<i64: 8, 1>}, {pipeline_mode = #tpu.pipeline_mode<synchronous>, transform_indices = @transform_3, window_bounds = array<i64: 3, 16, 8>}, {pipeline_mode = #tpu.pipeline_mode<synchronous>, transform_indices = @transform_4, window_bounds = array<i64: 1, 126>}, {transform_indices = @transform_5, window_bounds = array<i64: 1, 16, 2>}]} {
    %c0 = arith.constant 0 : index
    %c0_0 = arith.constant 0 : index
    %0 = vector.load %arg1[%c0, %c0_0] : memref<8x128xf32, #tpu.memory_space<vmem>>, vector<8x128xf32>
    %c0_1 = arith.constant 0 : index
    %c0_2 = arith.constant 0 : index
    %1 = vector.load %arg2[%c0_1, %c0_2] : memref<8x1xf32, #tpu.memory_space<vmem>>, vector<8x1xf32>
    %2 = vector.broadcast %1 : vector<8x1xf32> to vector<8x128xf32>
    %3 = arith.mulf %0, %2 : vector<8x128xf32>
    %c0_3 = arith.constant 0 : index
    %c0_4 = arith.constant 0 : index
    %4 = vector.load %arg3[%c0_3, %c0_4] : memref<8x1xf32, #tpu.memory_space<vmem>>, vector<8x1xf32>
    %5 = vector.broadcast %4 : vector<8x1xf32> to vector<8x128xf32>
    %6 = arith.addf %3, %5 : vector<8x128xf32>
    %cst = arith.constant 0.000000e+00 : f32
    %7 = vector.broadcast %cst : f32 to vector<8x128xf32>
    %8 = arith.maximumf %6, %7 : vector<8x128xf32>
    %cst_5 = arith.constant 0.000000e+00 : f32
    %9 = vector.broadcast %cst_5 : f32 to vector<16x126xf32>
    %c0_6 = arith.constant 0 : index
    %c0_7 = arith.constant 0 : index
    %c0_8 = arith.constant 0 : index
    %10 = vector.load %arg4[%c0_6, %c0_7, %c0_8] : memref<3x16x8xf32, #tpu.memory_space<vmem>>, vector<1x16x8xf32>
    %11 = vector.shape_cast %10 : vector<1x16x8xf32> to vector<16x8xf32>
    %12 = vector.extract_strided_slice %8 {offsets = [0, 0], sizes = [8, 126], strides = [1, 1]} : vector<8x128xf32> to vector<8x126xf32>
    %cst_9 = arith.constant dense<0.000000e+00> : vector<16x126xf32>
    %13 = tpu.matmul %11, %12, %cst_9 {dimension_numbers = #tpu.dot_dimension_numbers<[1], [0], [0], [1], [0, 0, 1, 1], [], []>} : vector<16x8xf32>, vector<8x126xf32>, vector<16x126xf32> -> vector<16x126xf32>
    %14 = arith.addf %9, %13 : vector<16x126xf32>
    %c1 = arith.constant 1 : index
    %c0_10 = arith.constant 0 : index
    %c0_11 = arith.constant 0 : index
    %15 = vector.load %arg4[%c1, %c0_10, %c0_11] : memref<3x16x8xf32, #tpu.memory_space<vmem>>, vector<1x16x8xf32>
    %16 = vector.shape_cast %15 : vector<1x16x8xf32> to vector<16x8xf32>
    %17 = vector.extract_strided_slice %8 {offsets = [0, 1], sizes = [8, 126], strides = [1, 1]} : vector<8x128xf32> to vector<8x126xf32>
    %cst_12 = arith.constant dense<0.000000e+00> : vector<16x126xf32>
    %18 = tpu.matmul %16, %17, %cst_12 {dimension_numbers = #tpu.dot_dimension_numbers<[1], [0], [0], [1], [0, 0, 1, 1], [], []>} : vector<16x8xf32>, vector<8x126xf32>, vector<16x126xf32> -> vector<16x126xf32>
    %19 = arith.addf %14, %18 : vector<16x126xf32>
    %c2 = arith.constant 2 : index
    %c0_13 = arith.constant 0 : index
    %c0_14 = arith.constant 0 : index
    %20 = vector.load %arg4[%c2, %c0_13, %c0_14] : memref<3x16x8xf32, #tpu.memory_space<vmem>>, vector<1x16x8xf32>
    %21 = vector.shape_cast %20 : vector<1x16x8xf32> to vector<16x8xf32>
    %22 = vector.extract_strided_slice %8 {offsets = [0, 2], sizes = [8, 126], strides = [1, 1]} : vector<8x128xf32> to vector<8x126xf32>
    %cst_15 = arith.constant dense<0.000000e+00> : vector<16x126xf32>
    %23 = tpu.matmul %21, %22, %cst_15 {dimension_numbers = #tpu.dot_dimension_numbers<[1], [0], [0], [1], [0, 0, 1, 1], [], []>} : vector<16x8xf32>, vector<8x126xf32>, vector<16x126xf32> -> vector<16x126xf32>
    %24 = arith.addf %19, %23 : vector<16x126xf32>
    %c0_16 = arith.constant 0 : index
    %c0_17 = arith.constant 0 : index
    %25 = vector.load %arg5[%c0_16, %c0_17] : memref<1x126xf32, #tpu.memory_space<vmem>>, vector<1x126xf32>
    %cst_18 = arith.constant 0.000000e+00 : f32
    %26 = vector.broadcast %cst_18 : f32 to vector<1x126xf32>
    %27 = arith.cmpf ogt, %25, %26 : vector<1x126xf32>
    %cst_19 = arith.constant 0.000000e+00 : f32
    %28 = vector.shape_cast %27 : vector<1x126xi1> to vector<1x126xi1>
    %29 = vector.broadcast %28 : vector<1x126xi1> to vector<16x126xi1>
    %30 = vector.broadcast %cst_19 : f32 to vector<16x126xf32>
    %31 = arith.select %29, %24, %30 : vector<16x126xi1>, vector<16x126xf32>
    %cst_20 = arith.constant dense<0.000000e+00> : vector<16xf32>
    %32 = vector.multi_reduction <add>, %31, %cst_20 [1] : vector<16x126xf32> to vector<16xf32>
    %33 = vector.shape_cast %32 : vector<16xf32> to vector<16x1xf32>
    %34 = arith.mulf %31, %31 : vector<16x126xf32>
    %cst_21 = arith.constant dense<0.000000e+00> : vector<16xf32>
    %35 = vector.multi_reduction <add>, %34, %cst_21 [1] : vector<16x126xf32> to vector<16xf32>
    %36 = vector.shape_cast %35 : vector<16xf32> to vector<16x1xf32>
    %37 = tpu.concatenate %33, %36 in 1 : vector<16x1xf32>, vector<16x1xf32> -> vector<16x2xf32>
    %c0_22 = arith.constant 0 : index
    %c0_23 = arith.constant 0 : index
    %c0_24 = arith.constant 0 : index
    %38 = vector.load %arg6[%c0_22, %c0_23, %c0_24] : memref<1x16x2xf32, #tpu.memory_space<vmem>>, vector<1x16x2xf32>
    %39 = vector.shape_cast %38 : vector<1x16x2xf32> to vector<16x2xf32>
    %40 = vector.shape_cast %37 : vector<16x2xf32> to vector<1x16x2xf32>
    tpu.vector_store %arg6[%c0_22, %c0_23, %c0_24], %40 {strides = array<i32>} : memref<1x16x2xf32, #tpu.memory_space<vmem>>, vector<1x16x2xf32>,
    return
  }
  func.func @transform_0(%arg0: i32) -> (i32, i32) {
    %c0_i32 = arith.constant 0 : i32
    %c0_i32_0 = arith.constant 0 : i32
    return %c0_i32, %arg0 : i32, i32
  }
  func.func @transform_1(%arg0: i32) -> (i32, i32) {
    %c0_i32 = arith.constant 0 : i32
    %c0_i32_0 = arith.constant 0 : i32
    %c0_i32_1 = arith.constant 0 : i32
    return %c0_i32, %c0_i32_0 : i32, i32
  }
  func.func @transform_2(%arg0: i32) -> (i32, i32) {
    %c0_i32 = arith.constant 0 : i32
    %c0_i32_0 = arith.constant 0 : i32
    %c0_i32_1 = arith.constant 0 : i32
    return %c0_i32, %c0_i32_0 : i32, i32
  }
  func.func @transform_3(%arg0: i32) -> (i32, i32, i32) {
    %c0_i32 = arith.constant 0 : i32
    %c0_i32_0 = arith.constant 0 : i32
    %c0_i32_1 = arith.constant 0 : i32
    %c0_i32_2 = arith.constant 0 : i32
    return %c0_i32, %c0_i32_0, %c0_i32_1 : i32, i32, i32
  }
  func.func @transform_4(%arg0: i32) -> (i32, i32) {
    %c0_i32 = arith.constant 0 : i32
    %c0_i32_0 = arith.constant 0 : i32
    %c0_i32_1 = arith.constant 0 : i32
    return %c0_i32, %c0_i32_0 : i32, i32
  }
  func.func @transform_5(%arg0: i32) -> (i32, i32, i32) {
    %c0_i32 = arith.constant 0 : i32
    %c0_i32_0 = arith.constant 0 : i32
    %c0_i32_1 = arith.constant 0 : i32
    return %arg0, %c0_i32, %c0_i32_0 : i32, i32, i32
  }
}

module attributes {stable_mosaic.version = 11 : i64} {
  func.func @kernel(%arg0: i32, %arg1: memref<8x128xf32, #tpu.memory_space<vmem>>, %arg2: memref<8x1xf32, #tpu.memory_space<vmem>>, %arg3: memref<8x1xf32, #tpu.memory_space<vmem>>, %arg4: memref<3x16x8xf32, #tpu.memory_space<vmem>>, %arg5: memref<16x1xf32, #tpu.memory_space<vmem>>, %arg6: memref<16x1xf32, #tpu.memory_space<vmem>>, %arg7: memref<16x128xf32, #tpu.memory_space<vmem>>) attributes {dimension_semantics = [#tpu.dimension_semantics<parallel>], iteration_bounds = array<i64: 2>, scalar_prefetch = 0 : i64, scratch_operands = 0 : i64, tpu.core_type = #tpu.core_type<tc>, window_params = [{transform_indices = @transform_0, window_bounds = array<i64: 8, 128>}, {pipeline_mode = #tpu.pipeline_mode<synchronous>, transform_indices = @transform_1, window_bounds = array<i64: 8, 1>}, {pipeline_mode = #tpu.pipeline_mode<synchronous>, transform_indices = @transform_2, window_bounds = array<i64: 8, 1>}, {pipeline_mode = #tpu.pipeline_mode<synchronous>, transform_indices = @transform_3, window_bounds = array<i64: 3, 16, 8>}, {pipeline_mode = #tpu.pipeline_mode<synchronous>, transform_indices = @transform_4, window_bounds = array<i64: 16, 1>}, {pipeline_mode = #tpu.pipeline_mode<synchronous>, transform_indices = @transform_5, window_bounds = array<i64: 16, 1>}, {transform_indices = @transform_6, window_bounds = array<i64: 16, 128>}]} {
    %c0 = arith.constant 0 : index
    %c0_0 = arith.constant 0 : index
    %0 = vector.load %arg1[%c0, %c0_0] : memref<8x128xf32, #tpu.memory_space<vmem>>, vector<8x128xf32>
    %c0_1 = arith.constant 0 : index
    %c0_2 = arith.constant 0 : index
    %1 = vector.load %arg2[%c0_1, %c0_2] : memref<8x1xf32, #tpu.memory_space<vmem>>, vector<8x1xf32>
    %2 = vector.broadcast %1 : vector<8x1xf32> to vector<8x128xf32>
    %3 = arith.mulf %0, %2 : vector<8x128xf32>
    %c0_3 = arith.constant 0 : index
    %c0_4 = arith.constant 0 : index
    %4 = vector.load %arg3[%c0_3, %c0_4] : memref<8x1xf32, #tpu.memory_space<vmem>>, vector<8x1xf32>
    %5 = vector.broadcast %4 : vector<8x1xf32> to vector<8x128xf32>
    %6 = arith.addf %3, %5 : vector<8x128xf32>
    %cst = arith.constant 0.000000e+00 : f32
    %7 = vector.broadcast %cst : f32 to vector<8x128xf32>
    %8 = arith.maximumf %6, %7 : vector<8x128xf32>
    %cst_5 = arith.constant 0.000000e+00 : f32
    %9 = vector.broadcast %cst_5 : f32 to vector<16x126xf32>
    %c0_6 = arith.constant 0 : index
    %c0_7 = arith.constant 0 : index
    %c0_8 = arith.constant 0 : index
    %10 = vector.load %arg4[%c0_6, %c0_7, %c0_8] : memref<3x16x8xf32, #tpu.memory_space<vmem>>, vector<1x16x8xf32>
    %11 = vector.shape_cast %10 : vector<1x16x8xf32> to vector<16x8xf32>
    %12 = vector.extract_strided_slice %8 {offsets = [0, 0], sizes = [8, 126], strides = [1, 1]} : vector<8x128xf32> to vector<8x126xf32>
    %cst_9 = arith.constant dense<0.000000e+00> : vector<16x126xf32>
    %13 = tpu.matmul %11, %12, %cst_9 {dimension_numbers = #tpu.dot_dimension_numbers<[1], [0], [0], [1], [0, 0, 1, 1], [], []>} : vector<16x8xf32>, vector<8x126xf32>, vector<16x126xf32> -> vector<16x126xf32>
    %14 = arith.addf %9, %13 : vector<16x126xf32>
    %c1 = arith.constant 1 : index
    %c0_10 = arith.constant 0 : index
    %c0_11 = arith.constant 0 : index
    %15 = vector.load %arg4[%c1, %c0_10, %c0_11] : memref<3x16x8xf32, #tpu.memory_space<vmem>>, vector<1x16x8xf32>
    %16 = vector.shape_cast %15 : vector<1x16x8xf32> to vector<16x8xf32>
    %17 = vector.extract_strided_slice %8 {offsets = [0, 1], sizes = [8, 126], strides = [1, 1]} : vector<8x128xf32> to vector<8x126xf32>
    %cst_12 = arith.constant dense<0.000000e+00> : vector<16x126xf32>
    %18 = tpu.matmul %16, %17, %cst_12 {dimension_numbers = #tpu.dot_dimension_numbers<[1], [0], [0], [1], [0, 0, 1, 1], [], []>} : vector<16x8xf32>, vector<8x126xf32>, vector<16x126xf32> -> vector<16x126xf32>
    %19 = arith.addf %14, %18 : vector<16x126xf32>
    %c2 = arith.constant 2 : index
    %c0_13 = arith.constant 0 : index
    %c0_14 = arith.constant 0 : index
    %20 = vector.load %arg4[%c2, %c0_13, %c0_14] : memref<3x16x8xf32, #tpu.memory_space<vmem>>, vector<1x16x8xf32>
    %21 = vector.shape_cast %20 : vector<1x16x8xf32> to vector<16x8xf32>
    %22 = vector.extract_strided_slice %8 {offsets = [0, 2], sizes = [8, 126], strides = [1, 1]} : vector<8x128xf32> to vector<8x126xf32>
    %cst_15 = arith.constant dense<0.000000e+00> : vector<16x126xf32>
    %23 = tpu.matmul %21, %22, %cst_15 {dimension_numbers = #tpu.dot_dimension_numbers<[1], [0], [0], [1], [0, 0, 1, 1], [], []>} : vector<16x8xf32>, vector<8x126xf32>, vector<16x126xf32> -> vector<16x126xf32>
    %24 = arith.addf %19, %23 : vector<16x126xf32>
    %c0_16 = arith.constant 0 : index
    %c0_17 = arith.constant 0 : index
    %25 = vector.load %arg5[%c0_16, %c0_17] : memref<16x1xf32, #tpu.memory_space<vmem>>, vector<16x1xf32>
    %26 = vector.broadcast %25 : vector<16x1xf32> to vector<16x126xf32>
    %27 = arith.mulf %24, %26 : vector<16x126xf32>
    %c0_18 = arith.constant 0 : index
    %c0_19 = arith.constant 0 : index
    %28 = vector.load %arg6[%c0_18, %c0_19] : memref<16x1xf32, #tpu.memory_space<vmem>>, vector<16x1xf32>
    %29 = vector.broadcast %28 : vector<16x1xf32> to vector<16x126xf32>
    %30 = arith.addf %27, %29 : vector<16x126xf32>
    %cst_20 = arith.constant 0.000000e+00 : f32
    %31 = vector.broadcast %cst_20 : f32 to vector<16x126xf32>
    %32 = arith.maximumf %30, %31 : vector<16x126xf32>
    %c0_21 = arith.constant 0 : index
    %c0_22 = arith.constant 0 : index
    %33 = vector.load %arg7[%c0_21, %c0_22] : memref<16x128xf32, #tpu.memory_space<vmem>>, vector<16x126xf32>
    tpu.vector_store %arg7[%c0_21, %c0_22], %32 {strides = array<i32>} : memref<16x128xf32, #tpu.memory_space<vmem>>, vector<16x126xf32>,
    %cst_23 = arith.constant 0.000000e+00 : f32
    %34 = vector.broadcast %cst_23 : f32 to vector<16x2xf32>
    %c0_24 = arith.constant 0 : index
    %c126 = arith.constant 126 : index
    %35 = vector.load %arg7[%c0_24, %c126] : memref<16x128xf32, #tpu.memory_space<vmem>>, vector<16x2xf32>
    tpu.vector_store %arg7[%c0_24, %c126], %34 {strides = array<i32>} : memref<16x128xf32, #tpu.memory_space<vmem>>, vector<16x2xf32>,
    return
  }
  func.func @transform_0(%arg0: i32) -> (i32, i32) {
    %c0_i32 = arith.constant 0 : i32
    %c0_i32_0 = arith.constant 0 : i32
    return %c0_i32, %arg0 : i32, i32
  }
  func.func @transform_1(%arg0: i32) -> (i32, i32) {
    %c0_i32 = arith.constant 0 : i32
    %c0_i32_0 = arith.constant 0 : i32
    %c0_i32_1 = arith.constant 0 : i32
    return %c0_i32, %c0_i32_0 : i32, i32
  }
  func.func @transform_2(%arg0: i32) -> (i32, i32) {
    %c0_i32 = arith.constant 0 : i32
    %c0_i32_0 = arith.constant 0 : i32
    %c0_i32_1 = arith.constant 0 : i32
    return %c0_i32, %c0_i32_0 : i32, i32
  }
  func.func @transform_3(%arg0: i32) -> (i32, i32, i32) {
    %c0_i32 = arith.constant 0 : i32
    %c0_i32_0 = arith.constant 0 : i32
    %c0_i32_1 = arith.constant 0 : i32
    %c0_i32_2 = arith.constant 0 : i32
    return %c0_i32, %c0_i32_0, %c0_i32_1 : i32, i32, i32
  }
  func.func @transform_4(%arg0: i32) -> (i32, i32) {
    %c0_i32 = arith.constant 0 : i32
    %c0_i32_0 = arith.constant 0 : i32
    %c0_i32_1 = arith.constant 0 : i32
    return %c0_i32, %c0_i32_0 : i32, i32
  }
  func.func @transform_5(%arg0: i32) -> (i32, i32) {
    %c0_i32 = arith.constant 0 : i32
    %c0_i32_0 = arith.constant 0 : i32
    %c0_i32_1 = arith.constant 0 : i32
    return %c0_i32, %c0_i32_0 : i32, i32
  }
  func.func @transform_6(%arg0: i32) -> (i32, i32) {
    %c0_i32 = arith.constant 0 : i32
    %c0_i32_0 = arith.constant 0 : i32
    return %c0_i32, %arg0 : i32, i32
  }
}

</mosaic_0001>

<bundles_post_ra>
// kernel: tile.10
= control target key start
LH: loop header
LB: loop body
LE: loop exit
PB: predicated region body
PF: predicated region fallthrough
CT: control target
= control target key end

     0   :  { %s22_s0 = inlined_call_operand.vmem [shape: f32[16], index: 0, kind: input, shape index: {}]   ;;  %s23_s1 = inlined_call_operand.vmem [shape: f32[8,16], index: 1, kind: output, shape index: {}]  }
   0x1   :  { %v4_v0 = vld [vmem:[%s22_s0] ss:$0 sm:$0xff] }
   0x2   :  { %5 = vst [vmem:[%s23_s1] sm:$0xff] %v4_v0 }

// kernel: tile.11
= control target key start
LH: loop header
LB: loop body
LE: loop exit
PB: predicated region body
PF: predicated region fallthrough
CT: control target
= control target key end

     0   :  { %s67_s10 = smov 112   ;;  %s68_s11 = smov 80   ;;  %vm3_vm0 = vcmask 130048   ;;  %vm9_vm1 = vcmask 1048448   ;;  %vm15_vm2 = vcmask 917248   ;;  %vm21_vm3 = vcmask 786048   ;;  %s111_s0 = inlined_call_operand.vmem [shape: f32[8,16], index: 0, kind: input, shape index: {}]   ;;  %s112_s1 = inlined_call_operand.vmem [shape: f32[128], index: 1, kind: output, shape index: {}]  }
   0x1   :  { %v53_v0 = vld [vmem:[%s111_s0 + $0x7] sm:$0x1]   ;;  %v55_v1 = vld [vmem:[%s111_s0 + $0x5] sm:$0x1]   ;;  %v54_v2 = vld [vmem:[%s111_s0 + $0x6] sm:$0x1]  }
   0x2   :  { %7 = vrot.lane.b32.xlu0 %v53_v0, %s67_s10  ;;  %19 = vrot.lane.b32.xlu1 %v55_v1, %s68_s11  ;;  %v56_v3 = vld [vmem:[%s111_s0 + $0x4] sm:$0x1]   ;;  %v2_v4 = vld [vmem:[%s111_s0] sm:$0x1]   ;;  %s69_s18 = smov 96   ;;  %s70_s19 = smov 64  }
   0x3   :  { %4 = vst.msk [vmem:[#allocation0] sm:$0x1] %vm3_vm0, %v2_v4   ;;  %v57_v5 = vld [vmem:[%s111_s0 + $0x3] sm:$0x1]   ;;  %v58_v6 = vld [vmem:[%s111_s0 + $0x2] sm:$0x1]  }
   0x4   :  { %s71_s24 = smov 48   ;;  %s72_s25 = smov 32   ;;  %v59_v7 = vld [vmem:[%s111_s0 + $0x1] sm:$0x1]   ;;  %vm27_vm4 = vcmask 654848   ;;  %vm33_vm5 = vcmask 523648  }
   0x5   :  { %s73_s0 = smov 16   ;;  %vm39_vm6 = vcmask 392448   ;;  %vm45_vm7 = vcmask 261248  }
   0x6   :  { %13 = vrot.lane.b32.xlu0 %v54_v2, %s69_s18  ;;  %25 = vrot.lane.b32.xlu1 %v56_v3, %s70_s19 }
   0xa   :  { %31 = vrot.lane.b32.xlu0 %v57_v5, %s71_s24  ;;  %37 = vrot.lane.b32.xlu1 %v58_v6, %s72_s25 }
   0xe   :  { %43 = vrot.lane.b32.xlu0 %v59_v7, %s73_s0 }
  0x74   :  { %v8_v8 = vpop.permute.xlu0 %7   ;;  %v20_v9 = vpop.permute.xlu1 %19  }
  0x75   :  { %10 = vst.msk [vmem:[#allocation0] sm:$0x1] %vm9_vm1, %v8_v8  }
  0x78   :  { %v14_v10 = vpop.permute.xlu0 %13   ;;  %v26_v11 = vpop.permute.xlu1 %25  }
  0x79   :  { %16 = vst.msk [vmem:[#allocation0] sm:$0x1] %vm15_vm2, %v14_v10  }
  0x7a   :  { %22 = vst.msk [vmem:[#allocation0] sm:$0x1] %vm21_vm3, %v20_v9  }
  0x7b   :  { %28 = vst.msk [vmem:[#allocation0] sm:$0x1] %vm27_vm4, %v26_v11  }
  0x7c   :  { %v32_v12 = vpop.permute.xlu0 %31   ;;  %v38_v13 = vpop.permute.xlu1 %37  }
  0x7d   :  { %34 = vst.msk [vmem:[#allocation0] sm:$0x1] %vm33_vm5, %v32_v12  }
  0x7e   :  { %40 = vst.msk [vmem:[#allocation0] sm:$0x1] %vm39_vm6, %v38_v13  }
  0x80   :  { %v44_v14 = vpop.permute.xlu0 %43  }
  0x81   :  { %46 = vst.msk [vmem:[#allocation0] sm:$0x1] %vm45_vm7, %v44_v14  }
  0x88   :  { %v50_v15 = vld [vmem:[#allocation0] sm:$0x1] }
  0x89   :  { %52 = vst [vmem:[%s112_s1] sm:$0x1] %v50_v15 }

// kernel: double_oned_conv_bn_relu.4
= control target key start
LH: loop header
LB: loop body
LE: loop exit
PB: predicated region body
PF: predicated region fallthrough
CT: control target
= control target key end

     0   :  { %s687_s18 = smov 0   ;;  %s741_s0 = inlined_call_operand.vmem [shape: f32[8,256], index: 0, kind: input, shape index: {}]   ;;  %s742_s1 = inlined_call_operand.vmem [shape: f32[8,1], index: 1, kind: input, shape index: {}]   ;;  %s743_s2 = inlined_call_operand.vmem [shape: f32[8,1], index: 2, kind: input, shape index: {}]   ;;  %s744_s3 = inlined_call_operand.vmem [shape: f32[3,16,8], index: 3, kind: input, shape index: {}]   ;;  %s745_s4 = inlined_call_operand.vmem [shape: f32[1,126], index: 4, kind: input, shape index: {}]   ;;  %s746_s5 = inlined_call_operand.vmem [shape: f32[2,16,2], index: 5, kind: output, shape index: {}]  }
   0x1 LB: > { %s585_s19 = sadd.s32 4294967295, %s652_s18   ;;  %p589_p0 = scmp.ge.s32.totalorder %s652_s18, 1  ;;  %s652_s18 = sphi %s687_s18, %s15_s18  }
   0x2   : > { %p186_p1 = scmp.lt.s32.totalorder %s652_s18, 3 }
   0x4   : > { %p187_p2 = pnand %p589_p0, %p186_p1 }
   0x5   : > { %v223_v0 = vld [vmem:[%s742_s1] sm:$0xff] (!%p187_p2)  ;;  %v654_v1 = vmov (!%p187_p2), 0   ;;  %vm247_vm0 = vcmask (!%p187_p2), 64512   ;;  %p213_p3 = scmp.lt.s32.totalorder (!%p187_p2), %s585_s19, 1  ;;  %v593_v4 = vld [vmem:[%s744_s3 + $0x10] sm:$0xff] (!%p187_p2)  ;;  %v239_v11 = vld [vmem:[%s744_s3 + $0x8] sm:$0xff] (!%p187_p2)  ;;  %v502_v17 = vlaneseq (!%p187_p2) }
   0x6   : > { %190 = sbr.rel (%p187_p2) target bundleno = 633 (0x279), region = 40  ;;  %645 = vset.pattern.permute.xlu0 (!%p187_p2), %v654_v1  ;;  %v230_v2 = vld [vmem:[%s743_s2] sm:$0xff] (!%p187_p2)  ;;  %617 = vmatprep.mubr.msk.f32.mxu1 (!%p187_p2), %vm247_vm0, %v593_v4  ;;  %s655_s9 = smov (!%p187_p2), 127   ;;  %v594_v14 = vld [vmem:[%s744_s3 + $0x18] sm:$0xff] (!%p187_p2)  ;;  %v600_v16 = vld [vmem:[%s744_s3 + $0x28] sm:$0xff] (!%p187_p2)  ;;  %vm509_vm3 = vcmask (!%p187_p2), 1031168  }
   0x7   : > { %226 = vperm.xlu0 (!%p187_p2), %645, %v223_v0   ;;  %v238_v3 = vld [vmem:[%s744_s3] sm:$0xff] (!%p187_p2)  ;;  %s656_s12 = smov (!%p187_p2), 126   ;;  %v503_v19 = vshrl.u32 (!%p187_p2), %v502_v17, 7  ;;  %vm524_vm4 = vcmask (!%p187_p2), 7168   ;;  %vm527_vm5 = vcmask (!%p187_p2), 15360  }
   0x8   : > { %622 = vmatprep.mubr.msk.f32.mxu0 (!%p187_p2), %vm247_vm0, %v238_v3  ;;  %v599_v12 = vld [vmem:[%s744_s3 + $0x20] sm:$0xff] (!%p187_p2) }
   0x9   : > { %v499_v18 = vld [vmem:[%s745_s4] sm:$0x1] (!%p187_p2)  ;;  %v504_v20 = vsub.s32 (!%p187_p2), 0, %v503_v19 }
   0xa   : > { %vm500_vm1 = vcmp.gt.f32.partialorder (!%p187_p2), %v499_v18, 0.0 }
   0xb   : > { %233 = vperm.xlu0 (!%p187_p2), %645, %v230_v2   ;;  %v501_v21 = vsel (!%p187_p2), %vm500_vm1, 1, %v654_v1 }
   0xc   : > { %v505_v22 = vrot.slane (!%p187_p2), %v501_v21, %v504_v20 }
   0xd   : > { %s748_s19 = smov (!%p213_p3, %s585_s19), 1 }
   0xe   : > { %s590_s26 = sshll.u32 %s748_s19, 3  ;;  %vm506_vm2 = vcmp.eq.s32.totalorder %v505_v22, 1  ;;  %s605_s21 = sshll.u32 %s748_s19, 4 }
   0xf   : > { %s216_s29 = scalar_lea.vmem %s741_s0, %s590_s26  ;;  %s221_s24 = scalar_lea.vmem %s746_s5, %s605_s21 }
  0x10   : > { %v222_v6 = vld [vmem:[%s216_s29] sm:$0xff] }
  0x86   : > { %v227_v5 = vpop.permute.xlu0 %226 }
  0x87   : > { %v229_v7 = vmul.f32 %v227_v5, %v222_v6 }
  0x8a   : > { %v234_v8 = vpop.permute.xlu0 %233 }
  0x8b   : > { %v236_v9 = vadd.f32 %v234_v8, %v229_v7 }
  0x8d   : > { %v237_v10 = vmax.f32 %v236_v9, 0.0 }
  0x8f   : > { %244 = vrot.lane.b32.xlu1 %v237_v10, %s655_s9  ;;  %620 = vmatprep.subr.mxu0 %v237_v10 }
  0x90   : > { %621 = vmatpush3.msra.mxu0 %v237_v10 }
  0x91   : > { %623 = vmatmul.mubr.msk.f32.vlgmr.msra.gmra.mrb[0].mxu0 %vm247_vm0, %v239_v11 }
  0x92   : > { %627 = vmatprep.mubr.msk.f32.mxu0 %vm247_vm0, %v599_v12 }
  0x93   : > { %413 = vrot.lane.b32.xlu1 %v237_v10, %s656_s12 }
 0x101   : > { %v245_v13 = vpop.permute.xlu1 %244 }
 0x102   : > { %615 = vmatprep.subr.mxu1 %v245_v13 }
 0x103   : > { %616 = vmatpush3.msra.mxu1 %v245_v13 }
 0x104   : > { %618 = vmatmul.mubr.msk.f32.vlgmr.msra.gmra.mrb[0].mxu1 %vm247_vm0, %v594_v14 }
 0x105   : > { %v414_v15 = vpop.permute.xlu1 %413 }
 0x106   : > { %625 = vmatprep.subr.mxu0 %v414_v15 }
 0x107   : > { %626 = vmatpush3.msra.mxu0 %v414_v15 }
 0x108   : > { %628 = vmatmul.mubr.msk.f32.vlgmr.msra.gmra.mrb[0].mxu0 %vm247_vm0, %v600_v16 }
 0x1d7   : > { %v619_v23 = vpop.f32.mrb[0].mxu1 }
 0x1d8   : > { %v320_v24 = vpop.f32.mrb[1].mxu1 }
 0x1db   : > { %v629_v25 = vpop.f32.mrb[0].mxu0 }
 0x1dc   : > { %v630_v26 = vadd.f32 %v629_v25, %v619_v23  ;;  %v488_v27 = vpop.f32.mrb[1].mxu0 }
 0x1dd   : > { %v631_v28 = vadd.f32 %v488_v27, %v320_v24 }
 0x1de   : > { %v508_v29 = vsel %vm506_vm2, %v630_v26, 0.0 }
 0x1df   : > { %v513_v30 = vsel %vm509_vm3, %v508_v29, 0.0  ;;  %v507_v31 = vsel %vm506_vm2, %v631_v28, 0.0  ;;  %v517_v35 = vmul.f32 %v508_v29, %v508_v29 }
 0x1e0   : > { %514 = vadd.xlane.f32.xlu1 %v513_v30  ;;  %v510_v32 = vsel %vm509_vm3, %v507_v31, 0.0  ;;  %v516_v33 = vmul.f32 %v507_v31, %v507_v31 }
 0x1e1   : > { %511 = vadd.xlane.f32.xlu0 %v510_v32  ;;  %v521_v36 = vsel %vm509_vm3, %v517_v35, 0.0 }
 0x1e2   : > { %v518_v34 = vsel %vm509_vm3, %v516_v33, 0.0 }
 0x1e5   : > { %519 = vadd.xlane.f32.xlu0 %v518_v34 }
 0x1e9   : > { %522 = vadd.xlane.f32.xlu0 %v521_v36 }
 0x26d   : > { %v515_v40 = vpop.xlane.xlu1 %514 }
 0x26e   : > { %v512_v37 = vpop.xlane.xlu0 %511 }
 0x272   : > { %v520_v38 = vpop.xlane.xlu0 %519 }
 0x273   : > { %v525_v39 = vsel %vm524_vm4, %v512_v37, %v520_v38 }
 0x274   : > { %528 = vst.msk [vmem:[%s221_s24] sm:$0xff] %vm527_vm5, %v525_v39 }
 0x276   : > { %v523_v41 = vpop.xlane.xlu0 %522 }
 0x277   : > { %v526_v42 = vsel %vm524_vm4, %v515_v40, %v523_v41 }
 0x278   : > { %529 = vst.msk [vmem:[%s221_s24 + $0x8] sm:$0xff] %vm527_vm5, %v526_v42 }
 0x279 PF: > { %s15_s18 = sadd.s32 1, %s652_s18  }
 0x27a   : > { %p12_p4 = scmp.ge.s32.totalorder %s15_s18, 4  }
 0x27c   :  { %14 = sbr.rel (!%p12_p4) target bundleno = 1 (0x1), region = 72 }

// kernel: double_oned_conv_bn_relu.3
= control target key start
LH: loop header
LB: loop body
LE: loop exit
PB: predicated region body
PF: predicated region fallthrough
CT: control target
= control target key end

     0   :  { %s644_s15 = smov 0   ;;  %s689_s0 = inlined_call_operand.vmem [shape: f32[4,256], index: 0, kind: input, shape index: {}]   ;;  %s690_s1 = inlined_call_operand.vmem [shape: f32[3,8,4], index: 1, kind: input, shape index: {}]   ;;  %s691_s2 = inlined_call_operand.vmem [shape: f32[1,126], index: 2, kind: input, shape index: {}]   ;;  %s692_s3 = inlined_call_operand.vmem [shape: f32[8,256], index: 3, kind: output, shape index: {0}]   ;;  %s693_s4 = inlined_call_operand.vmem [shape: f32[2,8,2], index: 4, kind: output, shape index: {1}]  }
   0x1 LB: > { %s551_s16 = sadd.s32 4294967295, %s612_s15   ;;  %p555_p0 = scmp.ge.s32.totalorder %s612_s15, 1  ;;  %s612_s15 = sphi %s644_s15, %s15_s15  }
   0x2   : > { %p164_p1 = scmp.lt.s32.totalorder %s612_s15, 3 }
   0x4   : > { %p165_p2 = pnand %p555_p0, %p164_p1 }
   0x5   : > { %p192_p3 = scmp.lt.s32.totalorder (!%p165_p2), %s551_s16, 1  ;;  %v614_v0 = vmov (!%p165_p2), 0.0   ;;  %vm615_vm0 = vmmov (!%p165_p2), 0   ;;  %vm215_vm1 = vcmask (!%p165_p2), 1043456   ;;  %v205_v1 = vld [vmem:[%s690_s1] sm:$0xff] (!%p165_p2)  ;;  %vm211_vm2 = vcmask (!%p165_p2), 31744  }
   0x6   : > { %168 = sbr.rel (%p165_p2) target bundleno = 501 (0x1f5), region = 32  ;;  %580 = vmatprep.subr.mxu0 (!%p165_p2), %v614_v0  ;;  %582 = vmatprep.mubr.msk.f32.mxu0 (!%p165_p2), %vm615_vm0, %v614_v0  ;;  %s616_s23 = smov (!%p165_p2), 127   ;;  %v559_v3 = vld [vmem:[%s690_s1 + $0x8] sm:$0xff] (!%p165_p2)  ;;  %v564_v5 = vld [vmem:[%s690_s1 + $0x10] sm:$0xff] (!%p165_p2)  ;;  %v450_v7 = vlaneseq (!%p165_p2)  ;;  %v447_v8 = vld [vmem:[%s691_s2] sm:$0x1] (!%p165_p2) }
   0x7   : > { %575 = vmatprep.subr.mxu1 (!%p165_p2), %v614_v0  ;;  %577 = vmatprep.mubr.msk.f32.mxu1 (!%p165_p2), %vm615_vm0, %v614_v0  ;;  %s617_s24 = smov (!%p165_p2), 126   ;;  %vm448_vm3 = vcmp.gt.f32.partialorder (!%p165_p2), %v447_v8, 0.0  ;;  %v618_v11 = vmov (!%p165_p2), 0   ;;  %vm443_vm4 = vcmask (!%p165_p2), 1031168   ;;  %vm445_vm6 = vcmask (!%p165_p2), 1048560  }
   0x8   : > { %v451_v9 = vshrl.u32 (!%p165_p2), %v450_v7, 7  ;;  %v449_v12 = vsel (!%p165_p2), %vm448_vm3, 1, %v618_v11  ;;  %vm463_vm7 = vcmask (!%p165_p2), 7168   ;;  %vm465_vm8 = vcmask (!%p165_p2), 15360  }
   0xa   : > { %v452_v10 = vsub.s32 (!%p165_p2), 0, %v451_v9 }
   0xc   : > { %v453_v14 = vrot.slane (!%p165_p2), %v449_v12, %v452_v10 }
   0xd   : > { %s695_s16 = smov (!%p192_p3, %s551_s16), 1 }
   0xe   : > { %s556_s17 = sshll.u32 %s695_s16, 2  ;;  %s557_s5 = sshll.u32 %s695_s16, 3  ;;  %vm454_vm5 = vcmp.eq.s32.totalorder %v453_v14, 1 }
   0xf   : > { %s195_s20 = scalar_lea.vmem %s689_s0, %s556_s17  ;;  %s199_s8 = scalar_lea.vmem %s692_s3, %s557_s5 }
  0x10   : > { %v204_v2 = vld [vmem:[%s195_s20] sm:$0xf]  ;;  %s203_s11 = scalar_lea.vmem %s693_s4, %s557_s5 }
  0x11   : > { %209 = vrot.lane.b32.xlu0 %v204_v2, %s616_s23  ;;  %581 = vmatpush3.msk.msra.mxu0 %vm215_vm1, %v204_v2 }
  0x12   : > { %583 = vmatmul.mubr.msk.f32.vlgmr.msra.gmra.mrb[0].mxu0 %vm211_vm2, %v205_v1  ;;  %585 = vmatprep.subr.mxu0 %v614_v0 }
  0x13   : > { %587 = vmatprep.mubr.msk.f32.mxu0 %vm615_vm0, %v614_v0 }
  0x15   : > { %365 = vrot.lane.b32.xlu0 %v204_v2, %s617_s24 }
  0x83   : > { %v210_v4 = vpop.permute.xlu0 %209 }
  0x84   : > { %576 = vmatpush3.msk.msra.mxu1 %vm215_vm1, %v210_v4 }
  0x85   : > { %578 = vmatmul.mubr.msk.f32.vlgmr.msra.gmra.mrb[0].mxu1 %vm211_vm2, %v559_v3 }
  0x87   : > { %v366_v6 = vpop.permute.xlu0 %365 }
  0x88   : > { %586 = vmatpush3.msk.msra.mxu0 %vm215_vm1, %v366_v6 }
  0x89   : > { %588 = vmatmul.mubr.msk.f32.vlgmr.msra.gmra.mrb[0].mxu0 %vm211_vm2, %v564_v5 }
 0x158   : > { %v284_v13 = vpop.f32.mrb[0].mxu1 }
 0x159   : > { %v579_v15 = vpop.f32.mrb[1].mxu1 }
 0x15c   : > { %v438_v16 = vpop.f32.mrb[0].mxu0 }
 0x15d   : > { %v590_v17 = vadd.f32 %v438_v16, %v284_v13  ;;  %v589_v18 = vpop.f32.mrb[1].mxu0 }
 0x15f   : > { %v455_v19 = vsel %vm454_vm5, %v590_v17, 0.0  ;;  %444 = vst.msk [vmem:[%s199_s8] sm:$0xff] %vm443_vm4, %v590_v17 }
 0x160   : > { %v456_v20 = vsel %vm443_vm4, %v455_v19, 0.0  ;;  %v459_v21 = vmul.f32 %v455_v19, %v455_v19  ;;  %446 = vst.msk [vmem:[%s199_s8] sm:$0xff] %vm445_vm6, %v614_v0 }
 0x161   : > { %457 = vadd.xlane.f32.xlu1 %v456_v20 }
 0x162   : > { %v460_v22 = vsel %vm443_vm4, %v459_v21, 0.0 }
 0x165   : > { %461 = vadd.xlane.f32.xlu1 %v460_v22 }
 0x1ee   : > { %v458_v23 = vpop.xlane.xlu1 %457 }
 0x1f2   : > { %v462_v24 = vpop.xlane.xlu1 %461 }
 0x1f3   : > { %v464_v25 = vsel %vm463_vm7, %v458_v23, %v462_v24 }
 0x1f4   : > { %466 = vst.msk [vmem:[%s203_s11] sm:$0xff] %vm465_vm8, %v464_v25 }
 0x1f5 PF: > { %s15_s15 = sadd.s32 1, %s612_s15  }
 0x1f6   : > { %p12_p4 = scmp.ge.s32.totalorder %s15_s15, 4  }
 0x1f8   :  { %14 = sbr.rel (!%p12_p4) target bundleno = 1 (0x1), region = 76 }

// kernel: double_oned_conv_bn_relu.5
= control target key start
LH: loop header
LB: loop body
LE: loop exit
PB: predicated region body
PF: predicated region fallthrough
CT: control target
= control target key end

     0   :  { %s793_s21 = smov 0   ;;  %s795_s22 = smov 0   ;;  %s886_s0 = inlined_call_operand.vmem [shape: f32[8,256], index: 0, kind: input, shape index: {}]   ;;  %s887_s1 = inlined_call_operand.vmem [shape: f32[8,1], index: 1, kind: input, shape index: {}]   ;;  %s888_s2 = inlined_call_operand.vmem [shape: f32[8,1], index: 2, kind: input, shape index: {}]   ;;  %s889_s3 = inlined_call_operand.vmem [shape: f32[3,16,8], index: 3, kind: input, shape index: {}]   ;;  %s890_s4 = inlined_call_operand.vmem [shape: f32[16,1], index: 4, kind: input, shape index: {}]   ;;  %s891_s5 = inlined_call_operand.vmem [shape: f32[16,1], index: 5, kind: input, shape index: {}]   ;;  %s892_s6 = inlined_call_operand.vmem [shape: f32[16,256], index: 6, kind: output, shape index: {}]  }
   0x1   :  { %s797_s23 = smov 0  }
   0x2 LB: > { %s806_s24 = sadd.s32 4294967295, %s752_s23   ;;  %s808_s25 = sadd.s32 1, %s752_s23   ;;  %s752_s23 = sphi %s797_s23, %s896_s23   ;;  %s748_s22 = sphi %s795_s22, %s895_s22   ;;  %s744_s21 = sphi %s793_s21, %s894_s21  }
   0x3   : > { %s151_s26 = ssub.s32 %s752_s23, %s808_s25  ;;  %s154_s27 = sadd.s32 1, %s748_s22 }
   0x4   : > { %p152_p0 = scmp.eq.s32.totalorder %s151_s26, 0  ;;  %p164_p1 = scmp.ne.s32.totalorder %s748_s22, %s744_s21 }
   0x5   : > { %p165_p2 = scmp.eq.s32.totalorder %s806_s24, 1  ;;  %p655_p3 = scmp.ge.s32.totalorder %s752_s23, 1 }
   0x6   : > { %s816_s28 = scalar_select %p152_p0, %s748_s22, %s154_s27  }
   0x7   : > { %p818_p4 = por %p165_p2, %p164_p1  ;;  %p211_p5 = scmp.lt.s32.totalorder %s752_s23, 3 }
   0x9   : > { %p212_p6 = pnand %p655_p3, %p211_p5 }
   0xa   : > { %v244_v0 = vld [vmem:[%s887_s1] sm:$0xff] (!%p212_p6)  ;;  %v754_v1 = vmov (!%p212_p6), 0   ;;  %vm268_vm0 = vcmask (!%p212_p6), 64512   ;;  %p239_p7 = scmp.lt.s32.totalorder (!%p212_p6), %s806_s24, 1  ;;  %v658_v6 = vld [vmem:[%s889_s3 + $0x10] sm:$0xff] (!%p212_p6)  ;;  %v260_v13 = vld [vmem:[%s889_s3 + $0x8] sm:$0xff] (!%p212_p6) }
   0xb   : > { %215 = sbr.rel (%p212_p6) target bundleno = 500 (0x1f4), region = 44  ;;  %728 = vset.pattern.permute.xlu0 (!%p212_p6), %v754_v1  ;;  %729 = vset.pattern.permute.xlu1 (!%p212_p6), %v754_v1  ;;  %v251_v2 = vld [vmem:[%s888_s2] sm:$0xff] (!%p212_p6)  ;;  %s755_s7 = smov (!%p212_p6), 127   ;;  %v521_v15 = vld [vmem:[%s890_s4 + $0x8] sm:$0xff] (!%p212_p6)  ;;  %v659_v18 = vld [vmem:[%s889_s3 + $0x18] sm:$0xff] (!%p212_p6)  ;;  %vm550_vm1 = vcmask (!%p212_p6), 1031168  }
   0xc   : > { %247 = vperm.xlu0 (!%p212_p6), %728, %v244_v0   ;;  %v520_v3 = vld [vmem:[%s890_s4] sm:$0xff] (!%p212_p6)  ;;  %683 = vmatprep.mubr.msk.f32.mxu1 (!%p212_p6), %vm268_vm0, %v658_v6  ;;  %s756_s10 = smov (!%p212_p6), 126   ;;  %v535_v16 = vld [vmem:[%s891_s5 + $0x8] sm:$0xff] (!%p212_p6)  ;;  %s236_s19 = sand.u32 (!%p212_p6), 1, %s744_s21   ;;  %vm553_vm2 = vcmask (!%p212_p6), 1048560   ;;  %v757_v37 = vmov (!%p212_p6), 0.0  }
   0xd   : > { %v534_v4 = vld [vmem:[%s891_s5] sm:$0xff] (!%p212_p6)  ;;  %v665_v20 = vld [vmem:[%s889_s3 + $0x28] sm:$0xff] (!%p212_p6) }
   0xe   : > { %v259_v5 = vld [vmem:[%s889_s3] sm:$0xff] (!%p212_p6) }
   0xf   : > { %688 = vmatprep.mubr.msk.f32.mxu0 (!%p212_p6), %vm268_vm0, %v259_v5  ;;  %v664_v14 = vld [vmem:[%s889_s3 + $0x20] sm:$0xff] (!%p212_p6) }
  0x10   : > { %254 = vperm.xlu0 (!%p212_p6), %728, %v251_v2  }
  0x12   : > { %s240_s16 = scalar_select %p239_p7, %s806_s24, 1 }
  0x13   : > { %s669_s21 = sshll.u32 (%p818_p4), %s806_s24, 3 }
  0x14   : > { %524 = vperm.xlu0 %728, %v520_v3   ;;  %s657_s17 = sshll.u32 %s240_s16, 3  ;;  %s564_s30 = scalar_lea.vmem (%p818_p4), %s892_s6, %s669_s21 }
  0x15   : > { %s242_s20 = scalar_lea.vmem %s886_s0, %s657_s17 }
  0x16   : > { %v243_v8 = vld [vmem:[%s242_s20] sm:$0xff]  ;;  %s656_s20 = sshll.u32 %s236_s19, 4 }
  0x17   : > { %s238_s23 = scalar_lea.vmem [#allocation2], %s656_s20 }
  0x18   : > { %538 = vperm.xlu0 %728, %v534_v4  }
  0x8b   : > { %v248_v7 = vpop.permute.xlu0 %247 }
  0x8c   : > { %v250_v9 = vmul.f32 %v248_v7, %v243_v8 }
  0x8f   : > { %v255_v10 = vpop.permute.xlu0 %254 }
  0x90   : > { %v257_v11 = vadd.f32 %v255_v10, %v250_v9 }
  0x92   : > { %v258_v12 = vmax.f32 %v257_v11, 0.0 }
  0x93   : > { %v525_v24 = vpop.permute.xlu0 %524 }
  0x94   : > { %265 = vrot.lane.b32.xlu1 %v258_v12, %s755_s7  ;;  %686 = vmatprep.subr.mxu0 %v258_v12 }
  0x95   : > { %687 = vmatpush3.msra.mxu0 %v258_v12 }
  0x96   : > { %689 = vmatmul.mubr.msk.f32.vlgmr.msra.gmra.mrb[0].mxu0 %vm268_vm0, %v260_v13 }
  0x97   : > { %693 = vmatprep.mubr.msk.f32.mxu0 %vm268_vm0, %v664_v14  ;;  %v539_v32 = vpop.permute.xlu0 %538 }
  0x98   : > { %434 = vrot.lane.b32.xlu1 %v258_v12, %s756_s10 }
  0x9c   : > { %529 = vperm.xlu1 %729, %v521_v15  }
  0xa0   : > { %543 = vperm.xlu1 %729, %v535_v16  }
 0x106   : > { %v266_v17 = vpop.permute.xlu1 %265 }
 0x107   : > { %681 = vmatprep.subr.mxu1 %v266_v17 }
 0x108   : > { %682 = vmatpush3.msra.mxu1 %v266_v17 }
 0x109   : > { %684 = vmatmul.mubr.msk.f32.vlgmr.msra.gmra.mrb[0].mxu1 %vm268_vm0, %v659_v18 }
 0x10a   : > { %v435_v19 = vpop.permute.xlu1 %434 }
 0x10b   : > { %691 = vmatprep.subr.mxu0 %v435_v19 }
 0x10c   : > { %692 = vmatpush3.msra.mxu0 %v435_v19 }
 0x10d   : > { %694 = vmatmul.mubr.msk.f32.vlgmr.msra.gmra.mrb[0].mxu0 %vm268_vm0, %v665_v20 }
 0x11b   : > { %v530_v23 = vpop.permute.xlu1 %529 }
 0x11f   : > { %v544_v31 = vpop.permute.xlu1 %543 }
 0x1dc   : > { %v685_v21 = vpop.f32.mrb[0].mxu1 }
 0x1dd   : > { %v341_v22 = vpop.f32.mrb[1].mxu1 }
 0x1e0   : > { %v695_v25 = vpop.f32.mrb[0].mxu0 }
 0x1e1   : > { %v696_v26 = vadd.f32 %v695_v25, %v685_v21  ;;  %v509_v27 = vpop.f32.mrb[1].mxu0 }
 0x1e2   : > { %v697_v28 = vadd.f32 %v509_v27, %v341_v22 }
 0x1e3   : > { %v533_v29 = vmul.f32 %v696_v26, %v530_v23 }
 0x1e4   : > { %v532_v30 = vmul.f32 %v697_v28, %v525_v24 }
 0x1e5   : > { %v547_v33 = vadd.f32 %v544_v31, %v533_v29  ;;  %562 = sbr.rel (!%p818_p4) target bundleno = 500 (0x1f4), region = 48 }
 0x1e6   : > { %v546_v34 = vadd.f32 %v539_v32, %v532_v30 }
 0x1e7   : > { %v549_v35 = vmax.f32 %v547_v33, 0.0 }
 0x1e8   : > { %v548_v36 = vmax.f32 %v546_v34, 0.0 }
 0x1e9   : > { %552 = vst.msk [vmem:[%s238_s23 + $0x8] sm:$0xff] %vm550_vm1, %v549_v35 }
 0x1ea   : > { %551 = vst.msk [vmem:[%s238_s23] sm:$0xff] %vm550_vm1, %v548_v36 }
 0x1eb   : > { %555 = vst.msk [vmem:[%s238_s23 + $0x8] sm:$0xff] %vm553_vm2, %v757_v37  ;;  %554 = vst.msk [vmem:[%s238_s23] sm:$0xff] %vm553_vm2, %v757_v37 }
 0x1f2   : > { %v594_v38 = vld [vmem:[%s238_s23] sm:$0xff]  ;;  %v596_v39 = vld [vmem:[%s238_s23 + $0x8] sm:$0xff] }
 0x1f3   : > { %595 = vst [vmem:[%s564_s30] sm:$0xff] %v594_v38  ;;  %597 = vst [vmem:[%s564_s30 + $0x10] sm:$0xff] %v596_v39 }
 0x1f4 PF: > { %p13_p8 = scmp.ge.s32.totalorder %s808_s25, 4   ;;  %s894_s21 = smov %s748_s22 }
 0x1f5   : > { %s895_s22 = smov %s816_s28  ;;  %s896_s23 = smov %s808_s25 }
 0x1f6   :  { %15 = sbr.rel (!%p13_p8) target bundleno = 2 (0x2), region = 114 }

</bundles_post_ra>
